<compile_context>
chip_gen: v7x
topology: tpu7x:2x2x1
jax: 0.10.0
libtpu: 0.0.40
codegen_flags: <defaults>
</compile_context>

<pallas_src>
import functools
import math

import jax
import jax.numpy as jnp
from jax.experimental import pallas as pl
from jax.experimental.pallas import tpu as pltpu

IN_FEATURES = 1024
NUM_CLASSES = 2


def _round_up(n, m):
    return ((n + m - 1) // m) * m


def _min_sublane(dtype):
    # Minimum second-minor tile rows: 8 (4-byte), 16 (2-byte), 32 (1-byte).
    return {4: 8, 2: 16, 1: 32}.get(jnp.dtype(dtype).itemsize, 8)


def _face_attr_decoder_kernel(x_ref, w_ref, b_ref, out_ref):
    # x_ref: (TB, 1024) VMEM; w_ref: (1024, 2) VMEM (resident);
    # b_ref: (2,) SMEM scalars; out_ref: (TB, 2) VMEM.
    x = x_ref[...]
    w = w_ref[...]

    # Linear: MXU matmul with f32 accumulation (bf16 or f32 inputs).
    logits = jnp.dot(x, w, preferred_element_type=jnp.float32)  # (TB, 2) f32
    l0 = logits[:, 0:1] + b_ref[0]
    l1 = logits[:, 1:2] + b_ref[1]

    # 2-class log-softmax, closed form (numerically stable, VPU + EUP only):
    #   out_c = l_c - logaddexp(l0, l1)
    lse = jnp.logaddexp(l0, l1)                                  # (TB, 1)
    out = jnp.concatenate([l0 - lse, l1 - lse], axis=1)          # (TB, 2)
    out_ref[...] = out.astype(out_ref.dtype)


@functools.partial(
    jax.jit,
    static_argnames=("tile_batch", "buffer_count", "core_parallel", "allow_x_fusion"),
)
def face_attribute_decoder(
    x,
    mask,
    weight,
    bias,
    *,
    tile_batch=None,
    buffer_count=None,
    core_parallel=False,
    allow_x_fusion=False,
):
    """Forward pass of FaceAttributeDecoder.

    Args:
      x:      (B, 1024) activations (f32 or bf16; bf16 halves HBM read bytes).
      mask:   arbitrary array, passed through unchanged.
      weight: (1024, 2) linear weight, (in, out) layout (transpose of nn.Linear).
      bias:   (2,) linear bias.
      tile_batch: max rows per grid step (None -> 4096 f32 / 8192 bf16).
      buffer_count: optional pipeline depth for the x BlockSpec (e.g. 3).
      core_parallel: use pltpu.CORE_PARALLEL on the batch axis (v7x, 2 TCs).
      allow_x_fusion: allow XLA to fuse the producer of x into this call.
    Returns:
      (log_probs (B, 2) in x.dtype, mask)
    """
    B, F = x.shape
    if F != IN_FEATURES:
        raise ValueError(f"x must have {IN_FEATURES} features, got {F}")
    if weight.shape != (IN_FEATURES, NUM_CLASSES):
        raise ValueError(
            "weight must be (1024, 2) = (in_features, out_features); "
            "transpose the raw PyTorch nn.Linear weight (2, 1024) before calling."
        )

    x_item = jnp.dtype(x.dtype).itemsize
    sub = _min_sublane(x.dtype)

    # Tile size: dtype-aware default, rounded to the sublane multiple.
    if tile_batch is None:
        tile_batch = 8192 if x_item <= 2 else 4096
    tb = min(int(tile_batch), _round_up(B, sub))
    # Ensure >= 2 grid steps for mid-size batches so the batch axis can be
    # split across TensorCores (megacore / CORE_PARALLEL on v7x).
    if B > 2 * sub and pl.cdiv(B, tb) < 2:
        tb = _round_up(pl.cdiv(B, 2), sub)
    tb = max(sub, _round_up(tb, sub))
    grid = (pl.cdiv(B, tb),)

    # VMEM budget: actual buffer footprint + headroom (don't claim all of v7x's
    # 64 MiB).
    nbuf = 2 if buffer_count is None else int(buffer_count)
    vmem_need = (
        nbuf * tb * IN_FEATURES * x_item          # multi-buffered x tiles
        + nbuf * tb * NUM_CLASSES * x_item        # multi-buffered out tiles
        + IN_FEATURES * NUM_CLASSES * jnp.dtype(weight.dtype).itemsize
        + 4096                                    # bias + slack
    )
    vmem_limit = int(min(96 * 2**20, max(16 * 2**20, vmem_need + 4 * 2**20)))

    x_spec_kwargs = {}
    if buffer_count is not None:
        x_spec_kwargs["pipeline_mode"] = pl.Buffered(int(buffer_count))
    x_spec = pl.BlockSpec((tb, IN_FEATURES), lambda i: (i, 0), **x_spec_kwargs)

    dim_sem = (pltpu.CORE_PARALLEL,) if core_parallel else ("parallel",)

    bytes_accessed = (
        B * IN_FEATURES * x_item
        + IN_FEATURES * NUM_CLASSES * jnp.dtype(weight.dtype).itemsize
        + NUM_CLASSES * 4
        + B * NUM_CLASSES * x_item
    )

    out = pl.pallas_call(
        _face_attr_decoder_kernel,
        out_shape=jax.ShapeDtypeStruct((B, NUM_CLASSES), x.dtype),
        grid_spec=pltpu.PrefetchScalarGridSpec(
            num_scalar_prefetch=0,
            grid=grid,
            in_specs=[
                # x: tiled over batch -> pipelined DMA overlaps compute.
                x_spec,
                # weight: constant block index -> DMA'd once, VMEM-resident.
                pl.BlockSpec((IN_FEATURES, NUM_CLASSES), lambda i: (0, 0)),
                # bias: two scalars in SMEM (no 2/128-lane VMEM tile).
                pl.BlockSpec(memory_space=pltpu.MemorySpace.SMEM),
            ],
            out_specs=pl.BlockSpec((tb, NUM_CLASSES), lambda i: (i, 0)),
        ),
        compiler_params=pltpu.CompilerParams(
            dimension_semantics=dim_sem,
            vmem_limit_bytes=vmem_limit,
            allow_input_fusion=[True, False, False] if allow_x_fusion else None,
        ),
        cost_estimate=pl.CostEstimate(
            flops=2 * B * IN_FEATURES * NUM_CLASSES,
            transcendentals=2 * B,  # logaddexp: one exp + one log1p per row
            bytes_accessed=bytes_accessed,
        ),
    )(x, weight, bias.reshape(NUM_CLASSES).astype(jnp.float32))

    # mask is returned untouched, matching the PyTorch forward.
    return out, mask


if __name__ == "__main__":
    key = jax.random.PRNGKey(0)
    kx, km, kw, kb, kx2 = jax.random.split(key, 5)

    # Deterministic parameter init (Linear(1024, 2)), PyTorch-style uniform bound.
    bound = 1.0 / math.sqrt(IN_FEATURES)
    weight = jax.random.uniform(
        kw, (IN_FEATURES, NUM_CLASSES), minval=-bound, maxval=bound, dtype=jnp.float32
    )
    bias = jax.random.uniform(
        kb, (NUM_CLASSES,), minval=-bound, maxval=bound, dtype=jnp.float32
    )

    # --- Case 1: small f32 batch, single tile ---------------------------------
    B1 = 16
    x1 = jax.random.normal(kx, (B1, IN_FEATURES), dtype=jnp.float32)
    mask1 = jax.random.normal(km, (B1, 16, 16), dtype=jnp.float32)  # opaque pass-through

    out1, mask_out1 = face_attribute_decoder(x1, mask1, weight, bias)
    jax.block_until_ready((out1, mask_out1))

    ref1 = jax.nn.log_softmax(x1 @ weight + bias, axis=1)
    assert out1.shape == (B1, NUM_CLASSES)
    assert jnp.allclose(out1, ref1, atol=1e-5), "mismatch vs reference (case 1)"
    assert jnp.array_equal(mask_out1, mask1), "mask not passed through (case 1)"

    # --- Case 2: ragged batch vs tile (padded last tile, multi-step grid) -----
    B2 = 13
    x2 = jax.random.normal(kx2, (B2, IN_FEATURES), dtype=jnp.float32)
    mask2 = jnp.zeros((B2, 4), dtype=jnp.float32)

    out2, _ = face_attribute_decoder(x2, mask2, weight, bias, tile_batch=8)
    jax.block_until_ready(out2)

    ref2 = jax.nn.log_softmax(x2 @ weight + bias, axis=1)
    assert out2.shape == (B2, NUM_CLASSES)
    assert jnp.allclose(out2, ref2, atol=1e-5), "mismatch vs reference (case 2)"

    # --- Case 3: bf16 streaming path (half HBM bytes, f32 MXU accumulation) ---
    x3 = x1.astype(jnp.bfloat16)
    w3 = weight.astype(jnp.bfloat16)
    out3, _ = face_attribute_decoder(x3, mask1, w3, bias)
    jax.block_until_ready(out3)

    ref3 = jax.nn.log_softmax(
        x3.astype(jnp.float32) @ w3.astype(jnp.float32) + bias, axis=1
    )
    assert out3.dtype == jnp.bfloat16
    assert jnp.allclose(out3.astype(jnp.float32), ref3, atol=5e-2, rtol=5e-2), \
        "mismatch vs reference (case 3, bf16)"

    print("KERNEL_OK")
</pallas_src>

<mosaic_0001>
module attributes {stable_mosaic.version = 11 : i64} {
  func.func @_face_attr_decoder_kernel(%arg0: i32, %arg1: memref<16x1024xf32, #tpu.memory_space<vmem>>, %arg2: memref<1024x2xf32, #tpu.memory_space<vmem>>, %arg3: memref<2xf32, #tpu.memory_space<smem>>, %arg4: memref<16x2xf32, #tpu.memory_space<vmem>>) attributes {dimension_semantics = [#tpu.dimension_semantics<parallel>], iteration_bounds = array<i64: 1>, scalar_prefetch = 0 : i64, scratch_operands = 0 : i64, tpu.core_type = #tpu.core_type<tc>, window_params = [{transform_indices = @transform_0, window_bounds = array<i64: 16, 1024>}, {pipeline_mode = #tpu.pipeline_mode<synchronous>, transform_indices = @transform_1, window_bounds = array<i64: 1024, 2>}, {transform_indices = @transform_2, window_bounds = array<i64: 2>}, {transform_indices = @transform_3, window_bounds = array<i64: 16, 2>}]} {
    %c0 = arith.constant 0 : index
    %c0_0 = arith.constant 0 : index
    %0 = vector.load %arg1[%c0, %c0_0] : memref<16x1024xf32, #tpu.memory_space<vmem>>, vector<16x1024xf32>
    %c0_1 = arith.constant 0 : index
    %c0_2 = arith.constant 0 : index
    %1 = vector.load %arg2[%c0_1, %c0_2] : memref<1024x2xf32, #tpu.memory_space<vmem>>, vector<1024x2xf32>
    %cst = arith.constant dense<0.000000e+00> : vector<16x2xf32>
    %2 = tpu.matmul %0, %1, %cst {dimension_numbers = #tpu.dot_dimension_numbers<[1], [0], [0], [1], [0, 0, 1, 1], [], []>} : vector<16x1024xf32>, vector<1024x2xf32>, vector<16x2xf32> -> vector<16x2xf32>
    %3 = vector.extract_strided_slice %2 {offsets = [0, 0], sizes = [16, 1], strides = [1, 1]} : vector<16x2xf32> to vector<16x1xf32>
    %c0_3 = arith.constant 0 : index
    %4 = memref.load %arg3[%c0_3] : memref<2xf32, #tpu.memory_space<smem>>
    %5 = vector.broadcast %4 : f32 to vector<16x1xf32>
    %6 = arith.addf %3, %5 : vector<16x1xf32>
    %7 = vector.extract_strided_slice %2 {offsets = [0, 1], sizes = [16, 1], strides = [1, 1]} : vector<16x2xf32> to vector<16x1xf32>
    %c1 = arith.constant 1 : index
    %8 = memref.load %arg3[%c1] : memref<2xf32, #tpu.memory_space<smem>>
    %9 = vector.broadcast %8 : f32 to vector<16x1xf32>
    %10 = arith.addf %7, %9 : vector<16x1xf32>
    %11 = arith.maximumf %6, %10 : vector<16x1xf32>
    %12 = arith.subf %6, %10 : vector<16x1xf32>
    %13 = arith.cmpf one, %12, %12 : vector<16x1xf32>
    %14 = arith.addf %6, %10 : vector<16x1xf32>
    %15 = math.absf %12 : vector<16x1xf32>
    %cst_4 = arith.constant 0.000000e+00 : f32
    %16 = vector.broadcast %cst_4 : f32 to vector<16x1xf32>
    %17 = arith.subf %16, %15 : vector<16x1xf32>
    %18 = math.exp %17 : vector<16x1xf32>
    %19 = math.log1p %18 : vector<16x1xf32>
    %20 = arith.addf %11, %19 : vector<16x1xf32>
    %21 = arith.select %13, %14, %20 : vector<16x1xi1>, vector<16x1xf32>
    %22 = arith.subf %6, %21 : vector<16x1xf32>
    %23 = arith.subf %10, %21 : vector<16x1xf32>
    %24 = tpu.concatenate %22, %23 in 1 : vector<16x1xf32>, vector<16x1xf32> -> vector<16x2xf32>
    %c0_5 = arith.constant 0 : index
    %c0_6 = arith.constant 0 : index
    %25 = vector.load %arg4[%c0_5, %c0_6] : memref<16x2xf32, #tpu.memory_space<vmem>>, vector<16x2xf32>
    tpu.vector_store %arg4[%c0_5, %c0_6], %24 {strides = array<i32>} : memref<16x2xf32, #tpu.memory_space<vmem>>, vector<16x2xf32>,
    return
  }
  func.func @transform_0(%arg0: i32) -> (i32, i32) {
    %c0_i32 = arith.constant 0 : i32
    %c0_i32_0 = arith.constant 0 : i32
    return %arg0, %c0_i32 : i32, i32
  }
  func.func @transform_1(%arg0: i32) -> (i32, i32) {
    %c0_i32 = arith.constant 0 : i32
    %c0_i32_0 = arith.constant 0 : i32
    %c0_i32_1 = arith.constant 0 : i32
    return %c0_i32, %c0_i32_0 : i32, i32
  }
  func.func @transform_2(%arg0: i32) -> i32 {
    %c0_i32 = arith.constant 0 : i32
    %c0_i32_0 = arith.constant 0 : i32
    return %c0_i32 : i32
  }
  func.func @transform_3(%arg0: i32) -> (i32, i32) {
    %c0_i32 = arith.constant 0 : i32
    %c0_i32_0 = arith.constant 0 : i32
    return %arg0, %c0_i32 : i32, i32
  }
}

</mosaic_0001>

<bundles_post_ra>
// kernel: face_attribute_decoder.1
= control target key start
LH: loop header
LB: loop body
LE: loop exit
PB: predicated region body
PF: predicated region fallthrough
CT: control target
= control target key end

     0   :  { %8 = vsyncpa [#allocation3], 0  ;;  %s1326_s0 = inlined_call_operand.vmem [shape: f32[16,1024], index: 0, kind: input, shape index: {}]   ;;  %s1327_s1 = inlined_call_operand.vmem [shape: f32[1024,2], index: 1, kind: input, shape index: {}]   ;;  %s1328_s2 = inlined_call_operand.vmem [shape: f32[2], index: 2, kind: input, shape index: {}]   ;;  %s1329_s3 = inlined_call_operand.vmem [shape: f32[16,2], index: 3, kind: output, shape index: {}]  }
   0x1   :  { %s19_s14 = sshll.u32 %s1328_s2, 4  ;;  %s20_s14 = int_to_ptr.vmem [resolvable:$true] %s19_s14 }
   0x2   :  { %s840_s15 = scalar_lea.vmem %s20_s14, 16  ;;  %p845_p1 = scmp.lt.s32.totalorder %s20_s14, %s20_s14 }
   0x3   :  { %p841_p0 = scmp.ne.s32.totalorder %s20_s14, %s840_s15  ;;  %p846_p2 = scmp.lt.s32.totalorder %s840_s15, %s840_s15 }
   0x5   :  { %p847_p3 = por %p846_p2, %p845_p1 }
   0x7   :  { %p848_p4 = pnand %p847_p3, %p841_p0 }
   0x9   :  { %851 = shalt.err (!%p848_p4)
}
   0xa   :  { %s854_s16 = smov [#allocation2]  }
   0xb   :  { %22 = dma.vmem_to_smem %s20_s14, 16, %s854_s16, [#allocation3]  }
   0xc   :  { %852 = dma.done.wait [#allocation3], 16  }
   0xd   :  { %853 = vsyncadd [#allocation3], 4294967280 }
   0xe   :  { %26 = sfence }
   0xf   :  { %v59_v0 = vld [vmem:[%s1327_s1 + $0x80] sm:$0xff]  ;;  %v60_v1 = vld [vmem:[%s1327_s1 + $0x88] sm:$0xff]  ;;  %v61_v11 = vld [vmem:[%s1327_s1 + $0x90] sm:$0xff]  ;;  %s548_s23 = sld [smem:[#allocation2 + $0x1]]  ;;  %s471_s24 = sld [smem:[#allocation2]]  ;;  %vm537_vm4 = vcmask 7168  }
  0x10   :  { %v91_v2 = vld [vmem:[%s1327_s1 + $0x180] sm:$0xff]  ;;  %v701_v3 = vpack.c.bf16 %v60_v1, %v59_v0  ;;  %v92_v4 = vld [vmem:[%s1327_s1 + $0x188] sm:$0xff]  ;;  %v62_v13 = vld [vmem:[%s1327_s1 + $0x98] sm:$0xff]  ;;  %s856_s25 = smov 1   ;;  %vm540_vm5 = vcmask 15360  }
  0x11   :  { %v43_v5 = vld [vmem:[%s1327_s1] sm:$0xff]  ;;  %v44_v6 = vld [vmem:[%s1327_s1 + $0x8] sm:$0xff]  ;;  %v733_v7 = vpack.c.bf16 %v92_v4, %v91_v2  ;;  %v93_v14 = vld [vmem:[%s1327_s1 + $0x190] sm:$0xff]  ;;  %v705_v16 = vpack.c.bf16 %v62_v13, %v61_v11 }
  0x12   :  { %v703_v8 = vpack.c.bf16 %v44_v6, %v43_v5  ;;  %v75_v9 = vld [vmem:[%s1327_s1 + $0x100] sm:$0xff]  ;;  %v76_v10 = vld [vmem:[%s1327_s1 + $0x108] sm:$0xff]  ;;  %702 = vmatprep.subr.bf16.mxu0 %v701_v3  ;;  %v94_v15 = vld [vmem:[%s1327_s1 + $0x198] sm:$0xff] }
  0x13   :  { %v735_v12 = vpack.c.bf16 %v76_v10, %v75_v9  ;;  %734 = vmatprep.subr.bf16.mxu1 %v733_v7  ;;  %v737_v17 = vpack.c.bf16 %v94_v15, %v93_v14  ;;  %v45_v18 = vld [vmem:[%s1327_s1 + $0x10] sm:$0xff]  ;;  %v46_v19 = vld [vmem:[%s1327_s1 + $0x18] sm:$0xff]  ;;  %v63_v23 = vld [vmem:[%s1327_s1 + $0xa0] sm:$0xff] }
  0x14   :  { %704 = vmatpush3.bf16.msra.mxu0 %v703_v8  ;;  %v77_v20 = vld [vmem:[%s1327_s1 + $0x110] sm:$0xff]  ;;  %v707_v21 = vpack.c.bf16 %v46_v19, %v45_v18  ;;  %v78_v22 = vld [vmem:[%s1327_s1 + $0x118] sm:$0xff]  ;;  %v64_v24 = vld [vmem:[%s1327_s1 + $0xa8] sm:$0xff] }
  0x15   :  { %736 = vmatpush3.bf16.msra.mxu1 %v735_v12  ;;  %706 = vmatprep.subr.bf16.mxu0 %v705_v16  ;;  %v739_v25 = vpack.c.bf16 %v78_v22, %v77_v20  ;;  %v709_v26 = vpack.c.bf16 %v64_v24, %v63_v23  ;;  %v95_v27 = vld [vmem:[%s1327_s1 + $0x1a0] sm:$0xff]  ;;  %v96_v28 = vld [vmem:[%s1327_s1 + $0x1a8] sm:$0xff]  ;;  %v65_v35 = vld [vmem:[%s1327_s1 + $0xb0] sm:$0xff] }
  0x16   :  { %738 = vmatprep.subr.bf16.mxu1 %v737_v17  ;;  %v47_v29 = vld [vmem:[%s1327_s1 + $0x20] sm:$0xff]  ;;  %v741_v30 = vpack.c.bf16 %v96_v28, %v95_v27  ;;  %v48_v31 = vld [vmem:[%s1327_s1 + $0x28] sm:$0xff]  ;;  %v66_v36 = vld [vmem:[%s1327_s1 + $0xb8] sm:$0xff] }
  0x17   :  { %v79_v32 = vld [vmem:[%s1327_s1 + $0x120] sm:$0xff]  ;;  %v80_v33 = vld [vmem:[%s1327_s1 + $0x128] sm:$0xff]  ;;  %v711_v34 = vpack.c.bf16 %v48_v31, %v47_v29  ;;  %v97_v37 = vld [vmem:[%s1327_s1 + $0x1b0] sm:$0xff]  ;;  %v713_v39 = vpack.c.bf16 %v66_v36, %v65_v35 }
  0x18   :  { %708 = vmatpush3.bf16.msra.mxu0 %v707_v21  ;;  %v743_v38 = vpack.c.bf16 %v80_v33, %v79_v32  ;;  %v98_v40 = vld [vmem:[%s1327_s1 + $0x1b8] sm:$0xff]  ;;  %v49_v41 = vld [vmem:[%s1327_s1 + $0x30] sm:$0xff]  ;;  %v67_v46 = vld [vmem:[%s1327_s1 + $0xc0] sm:$0xff] }
  0x19   :  { %740 = vmatpush3.bf16.msra.mxu1 %v739_v25  ;;  %710 = vmatprep.subr.bf16.mxu0 %v709_v26  ;;  %v50_v42 = vld [vmem:[%s1327_s1 + $0x38] sm:$0xff]  ;;  %v745_v43 = vpack.c.bf16 %v98_v40, %v97_v37  ;;  %v81_v44 = vld [vmem:[%s1327_s1 + $0x130] sm:$0xff]  ;;  %v68_v47 = vld [vmem:[%s1327_s1 + $0xc8] sm:$0xff] }
  0x1a   :  { %742 = vmatprep.subr.bf16.mxu1 %v741_v30  ;;  %v82_v45 = vld [vmem:[%s1327_s1 + $0x138] sm:$0xff]  ;;  %v99_v48 = vld [vmem:[%s1327_s1 + $0x1c0] sm:$0xff]  ;;  %v100_v49 = vld [vmem:[%s1327_s1 + $0x1c8] sm:$0xff]  ;;  %v715_v50 = vpack.c.bf16 %v50_v42, %v49_v41  ;;  %v717_v52 = vpack.c.bf16 %v68_v47, %v67_v46 }
  0x1b   :  { %v747_v51 = vpack.c.bf16 %v82_v45, %v81_v44  ;;  %v51_v53 = vld [vmem:[%s1327_s1 + $0x40] sm:$0xff]  ;;  %v52_v54 = vld [vmem:[%s1327_s1 + $0x48] sm:$0xff]  ;;  %v749_v56 = vpack.c.bf16 %v100_v49, %v99_v48  ;;  %v69_v58 = vld [vmem:[%s1327_s1 + $0xd0] sm:$0xff] }
  0x1c   :  { %712 = vmatpush3.bf16.msra.mxu0 %v711_v34  ;;  %v83_v55 = vld [vmem:[%s1327_s1 + $0x140] sm:$0xff]  ;;  %v84_v57 = vld [vmem:[%s1327_s1 + $0x148] sm:$0xff]  ;;  %v70_v59 = vld [vmem:[%s1327_s1 + $0xd8] sm:$0xff]  ;;  %v719_v62 = vpack.c.bf16 %v52_v54, %v51_v53 }
  0x1d   :  { %744 = vmatpush3.bf16.msra.mxu1 %v743_v38  ;;  %714 = vmatprep.subr.bf16.mxu0 %v713_v39  ;;  %v101_v60 = vld [vmem:[%s1327_s1 + $0x1d0] sm:$0xff]  ;;  %v102_v61 = vld [vmem:[%s1327_s1 + $0x1d8] sm:$0xff]  ;;  %v751_v63 = vpack.c.bf16 %v84_v57, %v83_v55  ;;  %v721_v0 = vpack.c.bf16 %v70_v59, %v69_v58  ;;  %v71_v6 = vld [vmem:[%s1327_s1 + $0xe0] sm:$0xff] }
  0x1e   :  { %746 = vmatprep.subr.bf16.mxu1 %v745_v43  ;;  %v53_v1 = vld [vmem:[%s1327_s1 + $0x50] sm:$0xff]  ;;  %v54_v2 = vld [vmem:[%s1327_s1 + $0x58] sm:$0xff]  ;;  %v753_v4 = vpack.c.bf16 %v102_v61, %v101_v60  ;;  %v72_v7 = vld [vmem:[%s1327_s1 + $0xe8] sm:$0xff] }
  0x1f   :  { %v85_v3 = vld [vmem:[%s1327_s1 + $0x150] sm:$0xff]  ;;  %v86_v5 = vld [vmem:[%s1327_s1 + $0x158] sm:$0xff]  ;;  %v103_v8 = vld [vmem:[%s1327_s1 + $0x1e0] sm:$0xff]  ;;  %v723_v10 = vpack.c.bf16 %v54_v2, %v53_v1  ;;  %v725_v14 = vpack.c.bf16 %v72_v7, %v71_v6 }
  0x20   :  { %716 = vmatpush3.bf16.msra.mxu0 %v715_v50  ;;  %v104_v9 = vld [vmem:[%s1327_s1 + $0x1e8] sm:$0xff]  ;;  %v55_v11 = vld [vmem:[%s1327_s1 + $0x60] sm:$0xff]  ;;  %v755_v13 = vpack.c.bf16 %v86_v5, %v85_v3  ;;  %v30_v17 = vld [vmem:[%s1326_s0 + $0x18] sm:$0xff] }
  0x21   :  { %748 = vmatpush3.bf16.msra.mxu1 %v747_v51  ;;  %718 = vmatprep.subr.bf16.mxu0 %v717_v52  ;;  %v56_v12 = vld [vmem:[%s1327_s1 + $0x68] sm:$0xff]  ;;  %v87_v15 = vld [vmem:[%s1327_s1 + $0x160] sm:$0xff]  ;;  %v757_v18 = vpack.c.bf16 %v104_v9, %v103_v8  ;;  %v73_v20 = vld [vmem:[%s1327_s1 + $0xf0] sm:$0xff] }
  0x22   :  { %750 = vmatprep.subr.bf16.mxu1 %v749_v56  ;;  %v28_v16 = vld [vmem:[%s1326_s0 + $0x8] sm:$0xff]  ;;  %v74_v21 = vld [vmem:[%s1327_s1 + $0xf8] sm:$0xff]  ;;  %v105_v22 = vld [vmem:[%s1327_s1 + $0x1f0] sm:$0xff]  ;;  %310 = vmatprep.mubr.f32.mxu1 %v30_v17  ;;  %v727_v24 = vpack.c.bf16 %v56_v12, %v55_v11 }
  0x23   :  { %v88_v19 = vld [vmem:[%s1327_s1 + $0x168] sm:$0xff]  ;;  %235 = vmatprep.mubr.f32.mxu0 %v28_v16  ;;  %v106_v23 = vld [vmem:[%s1327_s1 + $0x1f8] sm:$0xff]  ;;  %v729_v26 = vpack.c.bf16 %v74_v21, %v73_v20  ;;  %v57_v27 = vld [vmem:[%s1327_s1 + $0x70] sm:$0xff] }
  0x24   :  { %720 = vmatpush3.bf16.msra.mxu0 %v719_v62  ;;  %v759_v25 = vpack.c.bf16 %v88_v19, %v87_v15  ;;  %v58_v28 = vld [vmem:[%s1327_s1 + $0x78] sm:$0xff]  ;;  %v89_v29 = vld [vmem:[%s1327_s1 + $0x170] sm:$0xff]  ;;  %v761_v30 = vpack.c.bf16 %v106_v23, %v105_v22  ;;  %v123_v32 = vld [vmem:[%s1327_s1 + $0x280] sm:$0xff] }
  0x25   :  { %752 = vmatpush3.bf16.msra.mxu1 %v751_v63  ;;  %722 = vmatprep.subr.bf16.mxu0 %v721_v0  ;;  %v90_v31 = vld [vmem:[%s1327_s1 + $0x178] sm:$0xff]  ;;  %v124_v33 = vld [vmem:[%s1327_s1 + $0x288] sm:$0xff]  ;;  %v155_v34 = vld [vmem:[%s1327_s1 + $0x380] sm:$0xff]  ;;  %v731_v36 = vpack.c.bf16 %v58_v28, %v57_v27 }
  0x26   :  { %754 = vmatprep.subr.bf16.mxu1 %v753_v4  ;;  %v156_v35 = vld [vmem:[%s1327_s1 + $0x388] sm:$0xff]  ;;  %v763_v37 = vpack.c.bf16 %v90_v31, %v89_v29  ;;  %v765_v38 = vpack.c.bf16 %v124_v33, %v123_v32  ;;  %v107_v39 = vld [vmem:[%s1327_s1 + $0x200] sm:$0xff]  ;;  %v125_v44 = vld [vmem:[%s1327_s1 + $0x290] sm:$0xff] }
  0x27   :  { %v108_v40 = vld [vmem:[%s1327_s1 + $0x208] sm:$0xff]  ;;  %v139_v41 = vld [vmem:[%s1327_s1 + $0x300] sm:$0xff]  ;;  %v797_v42 = vpack.c.bf16 %v156_v35, %v155_v34  ;;  %v126_v45 = vld [vmem:[%s1327_s1 + $0x298] sm:$0xff] }
  0x28   :  { %724 = vmatpush3.bf16.msra.mxu0 %v723_v10  ;;  %v140_v43 = vld [vmem:[%s1327_s1 + $0x308] sm:$0xff]  ;;  %v157_v46 = vld [vmem:[%s1327_s1 + $0x390] sm:$0xff]  ;;  %v158_v47 = vld [vmem:[%s1327_s1 + $0x398] sm:$0xff]  ;;  %v767_v50 = vpack.c.bf16 %v108_v40, %v107_v39  ;;  %v769_v52 = vpack.c.bf16 %v126_v45, %v125_v44 }
  0x29   :  { %756 = vmatpush3.bf16.msra.mxu1 %v755_v13  ;;  %726 = vmatprep.subr.bf16.mxu0 %v725_v14  ;;  %v27_v48 = vld [vmem:[%s1326_s0] sm:$0xff]  ;;  %v29_v49 = vld [vmem:[%s1326_s0 + $0x10] sm:$0xff]  ;;  %v799_v51 = vpack.c.bf16 %v140_v43, %v139_v41  ;;  %v110_v54 = vld [vmem:[%s1327_s1 + $0x218] sm:$0xff]  ;;  %v801_v56 = vpack.c.bf16 %v158_v47, %v157_v46 }
  0x2a   :  { %758 = vmatprep.subr.bf16.mxu1 %v757_v18  ;;  %v109_v53 = vld [vmem:[%s1327_s1 + $0x210] sm:$0xff]  ;;  %v142_v57 = vld [vmem:[%s1327_s1 + $0x318] sm:$0xff]  ;;  %v127_v58 = vld [vmem:[%s1327_s1 + $0x2a0] sm:$0xff] }
  0x2b   :  { %v141_v55 = vld [vmem:[%s1327_s1 + $0x310] sm:$0xff]  ;;  %v128_v59 = vld [vmem:[%s1327_s1 + $0x2a8] sm:$0xff]  ;;  %v159_v60 = vld [vmem:[%s1327_s1 + $0x3a0] sm:$0xff]  ;;  %v771_v62 = vpack.c.bf16 %v110_v54, %v109_v53 }
  0x2c   :  { %728 = vmatpush3.bf16.msra.mxu0 %v727_v24  ;;  %v160_v61 = vld [vmem:[%s1327_s1 + $0x3a8] sm:$0xff]  ;;  %v803_v63 = vpack.c.bf16 %v142_v57, %v141_v55  ;;  %v773_v0 = vpack.c.bf16 %v128_v59, %v127_v58  ;;  %v111_v1 = vld [vmem:[%s1327_s1 + $0x220] sm:$0xff]  ;;  %v129_v6 = vld [vmem:[%s1327_s1 + $0x2b0] sm:$0xff] }
  0x2d   :  { %760 = vmatpush3.bf16.msra.mxu1 %v759_v25  ;;  %730 = vmatprep.subr.bf16.mxu0 %v729_v26  ;;  %v112_v2 = vld [vmem:[%s1327_s1 + $0x228] sm:$0xff]  ;;  %v143_v3 = vld [vmem:[%s1327_s1 + $0x320] sm:$0xff]  ;;  %v805_v4 = vpack.c.bf16 %v160_v61, %v159_v60  ;;  %v130_v7 = vld [vmem:[%s1327_s1 + $0x2b8] sm:$0xff] }
  0x2e   :  { %762 = vmatprep.subr.bf16.mxu1 %v761_v30  ;;  %v144_v5 = vld [vmem:[%s1327_s1 + $0x328] sm:$0xff]  ;;  %v113_v8 = vld [vmem:[%s1327_s1 + $0x230] sm:$0xff]  ;;  %v162_v10 = vld [vmem:[%s1327_s1 + $0x3b8] sm:$0xff]  ;;  %v775_v11 = vpack.c.bf16 %v112_v2, %v111_v1  ;;  %v777_v16 = vpack.c.bf16 %v130_v7, %v129_v6 }
  0x2f   :  { %v161_v9 = vld [vmem:[%s1327_s1 + $0x3b0] sm:$0xff]  ;;  %v114_v12 = vld [vmem:[%s1327_s1 + $0x238] sm:$0xff]  ;;  %v36_v14 = vld [vmem:[%s1326_s0 + $0x48] sm:$0xff]  ;;  %v807_v15 = vpack.c.bf16 %v144_v5, %v143_v3 }
  0x30   :  { %732 = vmatpush3.bf16.msra.mxu0 %v731_v36  ;;  %v145_v13 = vld [vmem:[%s1327_s1 + $0x330] sm:$0xff]  ;;  %v146_v17 = vld [vmem:[%s1327_s1 + $0x338] sm:$0xff]  ;;  %v131_v18 = vld [vmem:[%s1327_s1 + $0x2c0] sm:$0xff]  ;;  %v809_v20 = vpack.c.bf16 %v162_v10, %v161_v9  ;;  %v779_v26 = vpack.c.bf16 %v114_v12, %v113_v8 }
  0x31   :  { %764 = vmatpush3.bf16.msra.mxu1 %v763_v37  ;;  %766 = vmatprep.subr.bf16.mxu0 %v765_v38  ;;  %v38_v19 = vld [vmem:[%s1326_s0 + $0x58] sm:$0xff]  ;;  %v132_v21 = vld [vmem:[%s1327_s1 + $0x2c8] sm:$0xff]  ;;  %v35_v22 = vld [vmem:[%s1326_s0 + $0x40] sm:$0xff]  ;;  %v811_v29 = vpack.c.bf16 %v146_v17, %v145_v13 }
  0x32   :  { %798 = vmatprep.subr.bf16.mxu1 %v797_v42  ;;  %v37_v23 = vld [vmem:[%s1326_s0 + $0x50] sm:$0xff]  ;;  %v163_v24 = vld [vmem:[%s1327_s1 + $0x3c0] sm:$0xff]  ;;  %v164_v25 = vld [vmem:[%s1327_s1 + $0x3c8] sm:$0xff]  ;;  %v781_v30 = vpack.c.bf16 %v132_v21, %v131_v18 }
  0x33   :  { %236 = vmatmul.mubr.f32.vlgmr.msra.gmra.mrb[0].mxu0 %v27_v48  ;;  %v115_v27 = vld [vmem:[%s1327_s1 + $0x240] sm:$0xff]  ;;  %v116_v28 = vld [vmem:[%s1327_s1 + $0x248] sm:$0xff]  ;;  %v813_v34 = vpack.c.bf16 %v164_v25, %v163_v24  ;;  %v133_v35 = vld [vmem:[%s1327_s1 + $0x2d0] sm:$0xff] }
  0x34   :  { %311 = vmatmul.mubr.f32.vlgmr.msra.gmra.mrb[0].mxu1 %v29_v49  ;;  %768 = vmatpush3.bf16.msra.mxu0 %v767_v50  ;;  %v147_v31 = vld [vmem:[%s1327_s1 + $0x340] sm:$0xff]  ;;  %v148_v32 = vld [vmem:[%s1327_s1 + $0x348] sm:$0xff]  ;;  %v134_v36 = vld [vmem:[%s1327_s1 + $0x2d8] sm:$0xff]  ;;  %v783_v40 = vpack.c.bf16 %v116_v28, %v115_v27 }
  0x35   :  { %800 = vmatpush3.bf16.msra.mxu1 %v799_v51  ;;  %770 = vmatprep.subr.bf16.mxu0 %v769_v52  ;;  %v32_v33 = vld [vmem:[%s1326_s0 + $0x28] sm:$0xff]  ;;  %v34_v37 = vld [vmem:[%s1326_s0 + $0x38] sm:$0xff]  ;;  %v165_v38 = vld [vmem:[%s1327_s1 + $0x3d0] sm:$0xff]  ;;  %v815_v41 = vpack.c.bf16 %v148_v32, %v147_v31  ;;  %v785_v42 = vpack.c.bf16 %v134_v36, %v133_v35 }
  0x36   :  { %802 = vmatprep.subr.bf16.mxu1 %v801_v56  ;;  %240 = vmatprep.mubr.f32.mxu0 %v36_v14  ;;  %v166_v39 = vld [vmem:[%s1327_s1 + $0x3d8] sm:$0xff]  ;;  %v117_v43 = vld [vmem:[%s1327_s1 + $0x250] sm:$0xff]  ;;  %v135_v48 = vld [vmem:[%s1327_s1 + $0x2e0] sm:$0xff] }
  0x37   :  { %315 = vmatprep.mubr.f32.mxu1 %v38_v19  ;;  %241 = vmatmul.mubr.f32.gmra.mrb[2].mxu0 %v35_v22  ;;  %v118_v44 = vld [vmem:[%s1327_s1 + $0x258] sm:$0xff]  ;;  %v149_v45 = vld [vmem:[%s1327_s1 + $0x350] sm:$0xff]  ;;  %v817_v46 = vpack.c.bf16 %v166_v39, %v165_v38  ;;  %v136_v49 = vld [vmem:[%s1327_s1 + $0x2e8] sm:$0xff] }
  0x38   :  { %772 = vmatpush3.bf16.msra.mxu0 %v771_v62  ;;  %316 = vmatmul.mubr.f32.gmra.mrb[2].mxu1 %v37_v23  ;;  %v150_v47 = vld [vmem:[%s1327_s1 + $0x358] sm:$0xff]  ;;  %v167_v50 = vld [vmem:[%s1327_s1 + $0x3e0] sm:$0xff]  ;;  %v168_v51 = vld [vmem:[%s1327_s1 + $0x3e8] sm:$0xff]  ;;  %v787_v52 = vpack.c.bf16 %v118_v44, %v117_v43  ;;  %v789_v54 = vpack.c.bf16 %v136_v49, %v135_v48  ;;  %v472_v49 = vstv %s471_s24 }
  0x39   :  { %804 = vmatpush3.bf16.msra.mxu1 %v803_v63  ;;  %774 = vmatprep.subr.bf16.mxu0 %v773_v0  ;;  %v819_v53 = vpack.c.bf16 %v150_v47, %v149_v45  ;;  %v119_v55 = vld [vmem:[%s1327_s1 + $0x260] sm:$0xff]  ;;  %v120_v56 = vld [vmem:[%s1327_s1 + $0x268] sm:$0xff]  ;;  %v821_v58 = vpack.c.bf16 %v168_v51, %v167_v50  ;;  %v137_v60 = vld [vmem:[%s1327_s1 + $0x2f0] sm:$0xff] }
  0x3a   :  { %806 = vmatprep.subr.bf16.mxu1 %v805_v4  ;;  %385 = vmatprep.mubr.f32.mxu0 %v32_v33  ;;  %v151_v57 = vld [vmem:[%s1327_s1 + $0x360] sm:$0xff]  ;;  %v152_v59 = vld [vmem:[%s1327_s1 + $0x368] sm:$0xff]  ;;  %v138_v61 = vld [vmem:[%s1327_s1 + $0x2f8] sm:$0xff]  ;;  %v791_v0 = vpack.c.bf16 %v120_v56, %v119_v55 }
  0x3b   :  { %460 = vmatprep.mubr.f32.mxu1 %v34_v37  ;;  %v169_v62 = vld [vmem:[%s1327_s1 + $0x3f0] sm:$0xff]  ;;  %v170_v63 = vld [vmem:[%s1327_s1 + $0x3f8] sm:$0xff]  ;;  %v823_v1 = vpack.c.bf16 %v152_v59, %v151_v57  ;;  %v793_v2 = vpack.c.bf16 %v138_v61, %v137_v60  ;;  %v31_v10 = vld [vmem:[%s1326_s0 + $0x20] sm:$0xff] }
  0x3c   :  { %776 = vmatpush3.bf16.msra.mxu0 %v775_v11  ;;  %v121_v3 = vld [vmem:[%s1327_s1 + $0x270] sm:$0xff]  ;;  %v122_v4 = vld [vmem:[%s1327_s1 + $0x278] sm:$0xff]  ;;  %v825_v5 = vpack.c.bf16 %v170_v63, %v169_v62  ;;  %v40_v12 = vld [vmem:[%s1326_s0 + $0x68] sm:$0xff] }
  0x3d   :  { %808 = vmatpush3.bf16.msra.mxu1 %v807_v15  ;;  %778 = vmatprep.subr.bf16.mxu0 %v777_v16  ;;  %v153_v6 = vld [vmem:[%s1327_s1 + $0x370] sm:$0xff]  ;;  %v154_v7 = vld [vmem:[%s1327_s1 + $0x378] sm:$0xff]  ;;  %v795_v8 = vpack.c.bf16 %v122_v4, %v121_v3  ;;  %v39_v14 = vld [vmem:[%s1326_s0 + $0x60] sm:$0xff] }
  0x3e   :  { %810 = vmatprep.subr.bf16.mxu1 %v809_v20  ;;  %v827_v9 = vpack.c.bf16 %v154_v7, %v153_v6  ;;  %v33_v11 = vld [vmem:[%s1326_s0 + $0x30] sm:$0xff]  ;;  %v42_v13 = vld [vmem:[%s1326_s0 + $0x78] sm:$0xff] }
  0x3f   :  { %v41_v15 = vld [vmem:[%s1326_s0 + $0x70] sm:$0xff]  ;;  %s855_s0 = smov 127  }
  0x40   :  { %780 = vmatpush3.bf16.msra.mxu0 %v779_v26 }
  0x41   :  { %812 = vmatpush3.bf16.msra.mxu1 %v811_v29  ;;  %782 = vmatprep.subr.bf16.mxu0 %v781_v30 }
  0x42   :  { %814 = vmatprep.subr.bf16.mxu1 %v813_v34 }
  0x44   :  { %784 = vmatpush3.bf16.msra.mxu0 %v783_v40  ;;  %v476_v40 = vstv %s548_s23 }
  0x45   :  { %816 = vmatpush3.bf16.msra.mxu1 %v815_v41  ;;  %786 = vmatprep.subr.bf16.mxu0 %v785_v42 }
  0x46   :  { %818 = vmatprep.subr.bf16.mxu1 %v817_v46 }
  0x48   :  { %788 = vmatpush3.bf16.msra.mxu0 %v787_v52 }
  0x49   :  { %820 = vmatpush3.bf16.msra.mxu1 %v819_v53  ;;  %790 = vmatprep.subr.bf16.mxu0 %v789_v54 }
  0x4a   :  { %822 = vmatprep.subr.bf16.mxu1 %v821_v58 }
  0x4c   :  { %792 = vmatpush3.bf16.msra.mxu0 %v791_v0 }
  0x4d   :  { %824 = vmatpush3.bf16.msra.mxu1 %v823_v1  ;;  %794 = vmatprep.subr.bf16.mxu0 %v793_v2 }
  0x4e   :  { %826 = vmatprep.subr.bf16.mxu1 %v825_v5 }
  0x50   :  { %796 = vmatpush3.bf16.msra.mxu0 %v795_v8 }
  0x51   :  { %828 = vmatpush3.bf16.msra.mxu1 %v827_v9 }
  0x53   :  { %386 = vmatmul.mubr.f32.vlgmr.msra.gmra.mrb[4].mxu0 %v31_v10 }
  0x54   :  { %461 = vmatmul.mubr.f32.vlgmr.msra.gmra.mrb[4].mxu1 %v33_v11  ;;  %390 = vmatprep.mubr.f32.mxu0 %v40_v12 }
  0x55   :  { %465 = vmatprep.mubr.f32.mxu1 %v42_v13 }
  0x57   :  { %391 = vmatmul.mubr.f32.gmra.mrb[6].mxu0 %v39_v14 }
  0x58   :  { %466 = vmatmul.mubr.f32.gmra.mrb[6].mxu1 %v41_v15 }
 0x106   :  { %v581_v16 = vpop.f32.mrb[0].mxu0 }
 0x107   :  { %v619_v17 = vpop.f32.mrb[0].mxu1  ;;  %v582_v18 = vpop.f32.mrb[1].mxu0 }
 0x108   :  { %v583_v19 = vadd.f32 %v582_v18, %v581_v16  ;;  %v620_v20 = vpop.f32.mrb[1].mxu1 }
 0x109   :  { %v621_v21 = vadd.f32 %v620_v20, %v619_v17 }
 0x10a   :  { %v584_v23 = vpop.f32.mrb[2].mxu0 }
 0x10b   :  { %v313_v22 = vadd.f32 %v621_v21, %v583_v19  ;;  %v622_v24 = vpop.f32.mrb[2].mxu1  ;;  %v585_v25 = vpop.f32.mrb[3].mxu0 }
 0x10c   :  { %v586_v26 = vadd.f32 %v585_v25, %v584_v23  ;;  %v623_v27 = vpop.f32.mrb[3].mxu1 }
 0x10d   :  { %v624_v28 = vadd.f32 %v623_v27, %v622_v24 }
 0x10f   :  { %v318_v29 = vadd.f32 %v624_v28, %v586_v26 }
 0x126   :  { %v657_v30 = vpop.f32.mrb[4].mxu0 }
 0x127   :  { %v658_v31 = vpop.f32.mrb[5].mxu0  ;;  %v695_v32 = vpop.f32.mrb[4].mxu1 }
 0x128   :  { %v659_v33 = vadd.f32 %v658_v31, %v657_v30  ;;  %v696_v34 = vpop.f32.mrb[5].mxu1 }
 0x129   :  { %v697_v35 = vadd.f32 %v696_v34, %v695_v32 }
 0x12a   :  { %v388_v36 = vadd.f32 %v659_v33, %v313_v22  ;;  %v660_v37 = vpop.f32.mrb[6].mxu0 }
 0x12b   :  { %v661_v38 = vpop.f32.mrb[7].mxu0  ;;  %v698_v39 = vpop.f32.mrb[6].mxu1 }
 0x12c   :  { %v463_v41 = vadd.f32 %v697_v35, %v388_v36  ;;  %v662_v42 = vadd.f32 %v661_v38, %v660_v37  ;;  %v699_v43 = vpop.f32.mrb[7].mxu1 }
 0x12d   :  { %v700_v44 = vadd.f32 %v699_v43, %v698_v39 }
 0x12e   :  { %v393_v45 = vadd.f32 %v662_v42, %v318_v29  ;;  %v1312_v46 = vadd.f32 %v476_v40, %v463_v41  ;;  %v473_v50 = vadd.f32 %v472_v49, %v463_v41 }
 0x130   :  { %v468_v47 = vadd.f32 %v700_v44, %v393_v45  ;;  %481 = vrot.lane.b32.xlu0 %v1312_v46, %s855_s0 }
 0x132   :  { %v1315_v48 = vadd.f32 %v476_v40, %v468_v47  ;;  %v474_v53 = vadd.f32 %v472_v49, %v468_v47 }
 0x134   :  { %483 = vrot.lane.b32.xlu0 %v1315_v48, %s855_s0 }
 0x1a2   :  { %v482_v51 = vpop.permute.xlu0 %481 }
 0x1a3   :  { %v489_v52 = vsub.f32 %v473_v50, %v482_v51  ;;  %v487_v10 = vmax.f32 %v473_v50, %v482_v51  ;;  %v493_v14 = vadd.f32 %v482_v51, %v473_v50 }
 0x1a5   :  { %v495_v54 = vand.u32 2147483647, %v489_v52  ;;  %vm491_vm1 = vcmp.ne.f32.partialorder %v489_v52, %v489_v52 }
 0x1a6   :  { %v484_v55 = vpop.permute.xlu0 %483 }
 0x1a7   :  { %v497_v56 = vsub.f32 0.0, %v495_v54  ;;  %v490_v57 = vsub.f32 %v474_v53, %v484_v55  ;;  %v488_v18 = vmax.f32 %v474_v53, %v484_v55  ;;  %v494_v22 = vadd.f32 %v484_v55, %v474_v53 }
 0x1a9   :  { %v499_v58 = vmul.f32 1.442695, %v497_v56  ;;  %v496_v59 = vand.u32 2147483647, %v490_v57  ;;  %vm492_vm3 = vcmp.ne.f32.partialorder %v490_v57, %v490_v57 }
 0x1ab   :  { %832 = vpow2.f32 %v499_v58  ;;  %v498_v60 = vsub.f32 0.0, %v496_v59 }
 0x1ad   :  { %v501_v61 = vmul.f32 1.442695, %v498_v60 }
 0x1af   :  { %834 = vpow2.f32 %v501_v61 }
 0x1b5   :  { %v833_v62 = vpop.eup %832 }
 0x1b6   :  { %v503_v63 = vadd.f32 1.0, %v833_v62  ;;  %v506_v2 = vmul.f32 -0.5, %v833_v62  ;;  %v509_v5 = vand.u32 2147483647, %v833_v62 }
 0x1b8   :  { %836 = vlog2.f32 %v503_v63  ;;  %v507_v4 = vadd.f32 1.0, %v506_v2  ;;  %vm510_vm0 = vcmp.lt.f32.partialorder %v509_v5, 0.0004427343 }
 0x1b9   :  { %v835_v0 = vpop.eup %834 }
 0x1ba   :  { %v512_v1 = vadd.f32 1.0, %v835_v0  ;;  %v515_v3 = vmul.f32 -0.5, %v835_v0  ;;  %v508_v9 = vmul.f32 %v833_v62, %v507_v4  ;;  %v518_v11 = vand.u32 2147483647, %v835_v0 }
 0x1bc   :  { %838 = vlog2.f32 %v512_v1  ;;  %v516_v7 = vadd.f32 1.0, %v515_v3  ;;  %vm519_vm2 = vcmp.lt.f32.partialorder %v518_v11, 0.0004427343 }
 0x1be   :  { %v517_v17 = vmul.f32 %v835_v0, %v516_v7 }
 0x1c2   :  { %v837_v6 = vpop.eup %836 }
 0x1c3   :  { %v505_v8 = vmul.f32 0.6931472, %v837_v6 }
 0x1c5   :  { %v511_v12 = vsel %vm510_vm0, %v508_v9, %v505_v8 }
 0x1c6   :  { %v839_v13 = vpop.eup %838  ;;  %v521_v15 = vadd.f32 %v511_v12, %v487_v10 }
 0x1c7   :  { %v514_v16 = vmul.f32 0.6931472, %v839_v13 }
 0x1c8   :  { %v523_v19 = vsel %vm491_vm1, %v493_v14, %v521_v15 }
 0x1c9   :  { %v520_v20 = vsel %vm519_vm2, %v517_v17, %v514_v16  ;;  %529 = vrot.lane.b32.xlu1 %v523_v19, %s856_s25  ;;  %v525_v21 = vsub.f32 %v473_v50, %v523_v19 }
 0x1ca   :  { %v522_v23 = vadd.f32 %v520_v20, %v488_v18 }
 0x1cc   :  { %v524_v24 = vsel %vm492_vm3, %v494_v22, %v522_v23 }
 0x1cd   :  { %v526_v25 = vsub.f32 %v474_v53, %v524_v24  ;;  %531 = vrot.lane.b32.xlu1 %v524_v24, %s856_s25 }
 0x23b   :  { %v530_v26 = vpop.permute.xlu1 %529 }
 0x23c   :  { %v535_v27 = vsub.f32 %v1312_v46, %v530_v26 }
 0x23e   :  { %v538_v28 = vsel %vm537_vm4, %v525_v21, %v535_v27 }
 0x23f   :  { %541 = vst.msk [vmem:[%s1329_s3] sm:$0xff] %vm540_vm5, %v538_v28  ;;  %v532_v29 = vpop.permute.xlu1 %531 }
 0x240   :  { %v536_v30 = vsub.f32 %v1315_v48, %v532_v29 }
 0x242   :  { %v539_v31 = vsel %vm537_vm4, %v526_v25, %v536_v30 }
 0x243   :  { %542 = vst.msk [vmem:[%s1329_s3 + $0x8] sm:$0xff] %vm540_vm5, %v539_v31 }
 0x244   :  { %547 = vsyncpa [#allocation3], 1 }

</bundles_post_ra>
